<compile_context>
chip_gen: v5e
topology: v5e:2x2
jax: 0.10.0
libtpu: 0.0.40
codegen_flags: <defaults>
</compile_context>

<pallas_src>
import jax
import jax.numpy as jnp
from jax.experimental import pallas as pl
from jax.experimental.pallas import tpu as pltpu

GAMMA = 2.0


def _focal_loss_kernel(x_ref, t_ref, sum_ref, acc_ref):
    """Grid iterates over row-tiles.

    acc_ref: (row_tile, N) f32 VMEM accumulator (elementwise adds per step).
    sum_ref: (1, 1) f32 SMEM output holding the raw (un-normalized) sum.
    """
    i = pl.program_id(0)

    @pl.when(i == 0)
    def _():
        acc_ref[...] = jnp.zeros_like(acc_ref)

    x = x_ref[...].astype(jnp.float32)
    t = t_ref[...].astype(jnp.float32)

    # One exp + one log1p per element (EUP), plus a cheap approx reciprocal.
    e = jnp.exp(-jnp.abs(x))                       # exp(-|x|)
    log1pe = jnp.log1p(e)                          # log(1 + exp(-|x|))
    inv = pl.reciprocal(1.0 + e, approx=True)      # 1 / (1 + exp(-|x|))

    # sigmoid(x):  x >= 0 -> 1/(1+e)   ;   x < 0 -> e/(1+e)
    p = jnp.where(x >= 0.0, inv, e * inv)

    # Numerically-stable BCE-with-logits (reduction='none', pos_weight=None):
    #   ce = max(x, 0) - x*t + log(1 + exp(-|x|))
    ce = jnp.maximum(x, 0.0) - x * t + log1pe

    # 1 - p_t  with  p_t = p*t + (1-p)*(1-t)   ==>   1 - p_t = p + t - 2*p*t
    one_minus_pt = p + t - 2.0 * p * t

    # gamma == 2 -> plain square; accumulate elementwise (VPU only).
    acc_ref[...] += ce * one_minus_pt * one_minus_pt

    @pl.when(i == pl.num_programs(0) - 1)
    def _():
        sum_ref[0, 0] = jnp.sum(acc_ref[...])


def _pick_row_tile(M: int, N: int, max_block_bytes: int = 4 * 1024 * 1024) -> int:
    """Largest row tile that (a) keeps each input block <= max_block_bytes and
    (b) evenly divides M (multiple of 8, or the full M for small inputs)."""
    max_rows = max(8, ((max_block_bytes // (N * 4)) // 8) * 8)
    if M <= max_rows:
        return M                      # single block covers the whole array
    r = max_rows
    while r >= 8:
        if M % r == 0:
            return r
        r -= 8
    # No suitable multiple-of-8 divisor: fall back to a single full block.
    # TODO(synk): cdiv + padded-tail masking for awkward M at very large sizes.
    return M


def focal_loss(inputs: jnp.ndarray, targets: jnp.ndarray,
               row_tile: int | None = None,
               reduction: str = "mean") -> jnp.ndarray:
    """Focal loss (gamma=2, pos_weight=None). Returns a scalar ('mean'/'sum')."""
    assert inputs.shape == targets.shape
    assert inputs.ndim == 2
    M, N = inputs.shape

    if row_tile is None:
        row_tile = _pick_row_tile(M, N)
    assert M % row_tile == 0, "row_tile must evenly divide the batch dimension"

    grid = (M // row_tile,)

    raw_sum = pl.pallas_call(
        _focal_loss_kernel,
        out_shape=jax.ShapeDtypeStruct((1, 1), jnp.float32),
        grid_spec=pltpu.PrefetchScalarGridSpec(
            num_scalar_prefetch=0,
            grid=grid,
            in_specs=[
                pl.BlockSpec((row_tile, N), lambda i: (i, 0)),
                pl.BlockSpec((row_tile, N), lambda i: (i, 0)),
            ],
            out_specs=pl.BlockSpec((1, 1), lambda i: (0, 0),
                                   memory_space=pltpu.SMEM),
            scratch_shapes=[pltpu.VMEM((row_tile, N), jnp.float32)],
        ),
        compiler_params=pltpu.CompilerParams(
            dimension_semantics=("arbitrary",),
            vmem_limit_bytes=32 * 1024 * 1024,
        ),
    )(inputs, targets)[0, 0]

    if reduction == "mean":
        return raw_sum / jnp.float32(M * N)
    elif reduction == "sum":
        return raw_sum
    else:
        raise ValueError(f"unsupported reduction: {reduction!r}")


def _focal_loss_ref(inputs, targets, gamma=GAMMA):
    p = jax.nn.sigmoid(inputs)
    ce = (jnp.maximum(inputs, 0.0) - inputs * targets
          + jnp.log1p(jnp.exp(-jnp.abs(inputs))))
    p_t = p * targets + (1.0 - p) * (1.0 - targets)
    return jnp.mean(ce * (1.0 - p_t) ** gamma)


if __name__ == "__main__":
    key = jax.random.PRNGKey(0)
    k1, k2, k3, k4 = jax.random.split(key, 4)

    # Case 1: small multi-label classification shape -> single-block path.
    batch, num_classes = 16, 128
    logits = jax.random.normal(k1, (batch, num_classes), dtype=jnp.float32)
    targets = (jax.random.uniform(k2, (batch, num_classes)) > 0.5
               ).astype(jnp.float32)

    loss = jax.block_until_ready(focal_loss(logits, targets))
    ref = jax.block_until_ready(_focal_loss_ref(logits, targets))
    # approx reciprocal => slightly relaxed tolerance vs. exact sigmoid ref
    assert jnp.allclose(loss, ref, rtol=5e-3, atol=1e-5), (loss, ref)

    # Case 2: force a multi-step grid to exercise the accumulator path.
    M2, N2 = 64, 256
    logits2 = jax.random.normal(k3, (M2, N2), dtype=jnp.float32)
    targets2 = (jax.random.uniform(k4, (M2, N2)) > 0.5).astype(jnp.float32)

    loss2 = jax.block_until_ready(focal_loss(logits2, targets2, row_tile=16))
    ref2 = jax.block_until_ready(_focal_loss_ref(logits2, targets2))
    assert jnp.allclose(loss2, ref2, rtol=5e-3, atol=1e-5), (loss2, ref2)

    print("KERNEL_OK")
</pallas_src>

<mosaic_0001>
module attributes {stable_mosaic.version = 11 : i64} {
  func.func @_focal_loss_kernel(%arg0: i32, %arg1: memref<16x128xf32, #tpu.memory_space<vmem>>, %arg2: memref<16x128xf32, #tpu.memory_space<vmem>>, %arg3: memref<1x1xf32, #tpu.memory_space<smem>>, %arg4: memref<16x128xf32, #tpu.memory_space<vmem>>) attributes {dimension_semantics = [#tpu.dimension_semantics<arbitrary>], iteration_bounds = array<i64: 1>, scalar_prefetch = 0 : i64, scratch_operands = 1 : i64, tpu.core_type = #tpu.core_type<tc>, window_params = [{transform_indices = @transform_0, window_bounds = array<i64: 16, 128>}, {transform_indices = @transform_1, window_bounds = array<i64: 16, 128>}, {transform_indices = @transform_2, window_bounds = array<i64: 1, 1>}]} {
    %c0_i32 = arith.constant 0 : i32
    %0 = arith.cmpi eq, %arg0, %c0_i32 : i32
    %1 = arith.extui %0 : i1 to i32
    %c0_i32_0 = arith.constant 0 : i32
    %2 = arith.cmpi ne, %1, %c0_i32_0 : i32
    scf.if %2 {
      %cst_14 = arith.constant 0.000000e+00 : f32
      %35 = vector.broadcast %cst_14 : f32 to vector<16x128xf32>
      %c0_15 = arith.constant 0 : index
      %c0_16 = arith.constant 0 : index
      %36 = vector.load %arg4[%c0_15, %c0_16] : memref<16x128xf32, #tpu.memory_space<vmem>>, vector<16x128xf32>
      tpu.vector_store %arg4[%c0_15, %c0_16], %35 {strides = array<i32>} : memref<16x128xf32, #tpu.memory_space<vmem>>, vector<16x128xf32>,
    } else {
    }
    %c0 = arith.constant 0 : index
    %c0_1 = arith.constant 0 : index
    %3 = vector.load %arg1[%c0, %c0_1] : memref<16x128xf32, #tpu.memory_space<vmem>>, vector<16x128xf32>
    %c0_2 = arith.constant 0 : index
    %c0_3 = arith.constant 0 : index
    %4 = vector.load %arg2[%c0_2, %c0_3] : memref<16x128xf32, #tpu.memory_space<vmem>>, vector<16x128xf32>
    %5 = math.absf %3 : vector<16x128xf32>
    %cst = arith.constant 0.000000e+00 : f32
    %6 = vector.broadcast %cst : f32 to vector<16x128xf32>
    %7 = arith.subf %6, %5 : vector<16x128xf32>
    %8 = math.exp %7 : vector<16x128xf32>
    %9 = math.log1p %8 : vector<16x128xf32>
    %cst_4 = arith.constant 1.000000e+00 : f32
    %10 = vector.broadcast %cst_4 : f32 to vector<16x128xf32>
    %11 = arith.addf %10, %8 : vector<16x128xf32>
    %12 = tpu.reciprocal %11 {approx = true} : vector<16x128xf32> -> vector<16x128xf32>
    %cst_5 = arith.constant 0.000000e+00 : f32
    %13 = vector.broadcast %cst_5 : f32 to vector<16x128xf32>
    %14 = arith.cmpf oge, %3, %13 : vector<16x128xf32>
    %15 = arith.mulf %8, %12 : vector<16x128xf32>
    %16 = arith.select %14, %12, %15 : vector<16x128xi1>, vector<16x128xf32>
    %cst_6 = arith.constant 0.000000e+00 : f32
    %17 = vector.broadcast %cst_6 : f32 to vector<16x128xf32>
    %18 = arith.maximumf %3, %17 : vector<16x128xf32>
    %19 = arith.mulf %3, %4 : vector<16x128xf32>
    %20 = arith.subf %18, %19 : vector<16x128xf32>
    %21 = arith.addf %20, %9 : vector<16x128xf32>
    %22 = arith.addf %16, %4 : vector<16x128xf32>
    %cst_7 = arith.constant 2.000000e+00 : f32
    %23 = vector.broadcast %cst_7 : f32 to vector<16x128xf32>
    %24 = arith.mulf %23, %16 : vector<16x128xf32>
    %25 = arith.mulf %24, %4 : vector<16x128xf32>
    %26 = arith.subf %22, %25 : vector<16x128xf32>
    %c0_8 = arith.constant 0 : index
    %c0_9 = arith.constant 0 : index
    %27 = vector.load %arg4[%c0_8, %c0_9] : memref<16x128xf32, #tpu.memory_space<vmem>>, vector<16x128xf32>
    %28 = arith.mulf %21, %26 : vector<16x128xf32>
    %29 = arith.mulf %28, %26 : vector<16x128xf32>
    %30 = arith.addf %27, %29 : vector<16x128xf32>
    %c0_10 = arith.constant 0 : index
    %c0_11 = arith.constant 0 : index
    %31 = vector.load %arg4[%c0_10, %c0_11] : memref<16x128xf32, #tpu.memory_space<vmem>>, vector<16x128xf32>
    tpu.vector_store %arg4[%c0_10, %c0_11], %30 {strides = array<i32>} : memref<16x128xf32, #tpu.memory_space<vmem>>, vector<16x128xf32>,
    %c0_i32_12 = arith.constant 0 : i32
    %32 = arith.cmpi eq, %arg0, %c0_i32_12 : i32
    %33 = arith.extui %32 : i1 to i32
    %c0_i32_13 = arith.constant 0 : i32
    %34 = arith.cmpi ne, %33, %c0_i32_13 : i32
    scf.if %34 {
      %c0_14 = arith.constant 0 : index
      %c0_15 = arith.constant 0 : index
      %35 = vector.load %arg4[%c0_14, %c0_15] : memref<16x128xf32, #tpu.memory_space<vmem>>, vector<16x128xf32>
      %36 = vector.shape_cast %35 : vector<16x128xf32> to vector<1x16x128xf32>
      %cst_16 = arith.constant dense<0.000000e+00> : vector<1xf32>
      %37 = vector.multi_reduction <add>, %36, %cst_16 [1, 2] : vector<1x16x128xf32> to vector<1xf32>
      %38 = vector.shape_cast %37 : vector<1xf32> to vector<1x1x1xf32>
      %39 = vector.extract %38[0, 0, 0] : f32 from vector<1x1x1xf32>
      %c0_17 = arith.constant 0 : index
      %c0_18 = arith.constant 0 : index
      %40 = memref.load %arg3[%c0_17, %c0_18] : memref<1x1xf32, #tpu.memory_space<smem>>
      memref.store %39, %arg3[%c0_17, %c0_18] : memref<1x1xf32, #tpu.memory_space<smem>>
    } else {
    }
    return
  }
  func.func @transform_0(%arg0: i32) -> (i32, i32) {
    %c0_i32 = arith.constant 0 : i32
    %c0_i32_0 = arith.constant 0 : i32
    return %arg0, %c0_i32 : i32, i32
  }
  func.func @transform_1(%arg0: i32) -> (i32, i32) {
    %c0_i32 = arith.constant 0 : i32
    %c0_i32_0 = arith.constant 0 : i32
    return %arg0, %c0_i32 : i32, i32
  }
  func.func @transform_2(%arg0: i32) -> (i32, i32) {
    %c0_i32 = arith.constant 0 : i32
    %c0_i32_0 = arith.constant 0 : i32
    %c0_i32_1 = arith.constant 0 : i32
    return %c0_i32, %c0_i32_0 : i32, i32
  }
}

</mosaic_0001>

<bundles_post_ra>
// kernel: tpu_custom_call.1
= control target key start
LH: loop header
LB: loop body
LE: loop exit
PB: predicated region body
PF: predicated region fallthrough
CT: control target
= control target key end

     0   :  { %7 = vsyncpa [#allocation4], 0  ;;  %s276_s0 = inlined_call_operand.hbm [shape: f32[16,128], index: 0, kind: input, shape index: {}]   ;;  %s277_s1 = inlined_call_operand.hbm [shape: f32[16,128], index: 1, kind: input, shape index: {}]   ;;  %s278_s2 = inlined_call_operand.hbm [shape: f32[1,1], index: 2, kind: output, shape index: {}]  }
   0x1   :  { %8 = vsyncpa [#allocation7], 0 }
   0x2   :  { %9 = vsyncpa [#allocation5], 0  ;;  %s14_s11 = sshll.u32 %s276_s0, 4  ;;  %s235_s12 = smov [#allocation3]   ;;  %s15_s11 = int_to_ptr.hbm [resolvable:$true] %s14_s11 }
   0x3   :  { %s16_s13 = sshll.u32 %s235_s12, 4  ;;  %s27_s16 = sshll.u32 %s277_s1, 4  ;;  %s17_s13 = int_to_ptr.vmem [resolvable:$true] %s16_s13  ;;  %s28_s16 = int_to_ptr.hbm [resolvable:$true] %s27_s16 }
   0x4   :  { %s236_s17 = smov 128   ;;  %s237_s18 = smov 8  }
   0x5   :  { %22 = dma.hbm_to_vmem [thread:$0]  %s15_s11, 256, %s17_s13, [#allocation4], %s236_s17, %s236_s17, %s237_s18  }
   0x6   :  { %s238_s19 = smov [#allocation6]  }
   0x7   :  { %s29_s20 = sshll.u32 %s238_s19, 4  ;;  %s30_s20 = int_to_ptr.vmem [resolvable:$true] %s29_s20 }
   0x8   :  { %35 = dma.hbm_to_vmem [thread:$0]  %s28_s16, 256, %s30_s20, [#allocation7], %s236_s17, %s236_s17, %s237_s18  }
   0x9   :  { %229 = dma.done.wait [#allocation4], 256  }
   0xa   :  { %230 = vsyncadd [#allocation4], 4294967040 }
   0xb   :  { %231 = dma.done.wait [#allocation7], 256  }
   0xc   :  { %232 = vsyncadd [#allocation7], 4294967040  ;;  %v50_v0 = vld [vmem:[#allocation3] sm:$0xff]  ;;  %v51_v1 = vld [vmem:[#allocation3 + $0x8] sm:$0xff]  ;;  %s138_s21 = sshll.u32 %s278_s2, 4  ;;  %s239_s23 = smov [#allocation8]   ;;  %s139_s21 = int_to_ptr.hbm [resolvable:$true] %s138_s21 }
   0xd   :  { %v54_v2 = vand.u32 2147483647, %v50_v0  ;;  %v55_v3 = vand.u32 2147483647, %v51_v1  ;;  %v52_v14 = vld [vmem:[#allocation6] sm:$0xff]  ;;  %v53_v16 = vld [vmem:[#allocation6 + $0x8] sm:$0xff] }
   0xe   :  { %v90_v21 = vmax.f32 %v50_v0, 0.0  ;;  %v92_v22 = vmul.f32 %v52_v14, %v50_v0  ;;  %v91_v26 = vmax.f32 %v51_v1, 0.0  ;;  %v93_v27 = vmul.f32 %v53_v16, %v51_v1 }
   0xf   :  { %v56_v4 = vsub.f32 0.0, %v54_v2  ;;  %v57_v5 = vsub.f32 0.0, %v55_v3  ;;  %vm84_vm1 = vcmp.ge.f32.partialorder %v50_v0, 0.0  ;;  %vm85_vm3 = vcmp.ge.f32.partialorder %v51_v1, 0.0 }
  0x10   :  { %v94_v36 = vsub.f32 %v90_v21, %v92_v22  ;;  %v95_v39 = vsub.f32 %v91_v26, %v93_v27 }
  0x11   :  { %v58_v6 = vmul.f32 1.442695, %v56_v4  ;;  %v60_v7 = vmul.f32 1.442695, %v57_v5 }
  0x13   :  { %157 = vpow2.f32 %v58_v6 }
  0x14   :  { %159 = vpow2.f32 %v60_v7 }
  0x19   :  { %v158_v8 = vpop.eup %157 }
  0x1a   :  { %v160_v9 = vpop.eup %159  ;;  %v62_v10 = vadd.f32 1.0, %v158_v8  ;;  %v65_v11 = vmul.f32 -0.5, %v158_v8  ;;  %v68_v17 = vand.u32 2147483647, %v158_v8 }
  0x1b   :  { %v71_v12 = vadd.f32 1.0, %v160_v9  ;;  %v74_v13 = vmul.f32 -0.5, %v160_v9  ;;  %v77_v19 = vand.u32 2147483647, %v160_v9 }
  0x1c   :  { %161 = vlog2.f32 %v62_v10  ;;  %v66_v15 = vadd.f32 1.0, %v65_v11  ;;  %vm261_vm0 = vcmp.lt.f32.partialorder %v68_v17, 0.0004427343 }
  0x1d   :  { %163 = vlog2.f32 %v71_v12  ;;  %v75_v18 = vadd.f32 1.0, %v74_v13  ;;  %vm265_vm2 = vcmp.lt.f32.partialorder %v77_v19, 0.0004427343 }
  0x1e   :  { %165 = vrcp.f32 %v62_v10  ;;  %v67_v25 = vmul.f32 %v158_v8, %v66_v15 }
  0x1f   :  { %167 = vrcp.f32 %v71_v12  ;;  %v76_v31 = vmul.f32 %v160_v9, %v75_v18 }
  0x22   :  { %v162_v20 = vpop.eup %161 }
  0x23   :  { %v164_v23 = vpop.eup %163  ;;  %v64_v24 = vmul.f32 0.6931472, %v162_v20 }
  0x24   :  { %v166_v28 = vpop.eup %165  ;;  %v73_v30 = vmul.f32 0.6931472, %v164_v23 }
  0x25   :  { %v168_v32 = vpop.eup %167  ;;  %v86_v34 = vmul.f32 %v166_v28, %v158_v8  ;;  %v70_v37 = vsel %vm261_vm0, %v67_v25, %v64_v24 }
  0x26   :  { %v87_v35 = vmul.f32 %v168_v32, %v160_v9  ;;  %v79_v40 = vsel %vm265_vm2, %v76_v31, %v73_v30  ;;  %v96_v46 = vadd.f32 %v94_v36, %v70_v37 }
  0x27   :  { %v88_v38 = vsel %vm84_vm1, %v166_v28, %v86_v34  ;;  %v97_v48 = vadd.f32 %v95_v39, %v79_v40 }
  0x28   :  { %v89_v41 = vsel %vm85_vm3, %v168_v32, %v87_v35  ;;  %v98_v42 = vadd.f32 %v88_v38, %v52_v14  ;;  %v100_v43 = vmul.f32 2.0, %v88_v38 }
  0x29   :  { %v99_v44 = vadd.f32 %v89_v41, %v53_v16  ;;  %v101_v45 = vmul.f32 2.0, %v89_v41 }
  0x2a   :  { %v102_v47 = vmul.f32 %v100_v43, %v52_v14 }
  0x2b   :  { %v103_v49 = vmul.f32 %v101_v45, %v53_v16 }
  0x2c   :  { %v104_v50 = vsub.f32 %v98_v42, %v102_v47 }
  0x2d   :  { %v105_v51 = vsub.f32 %v99_v44, %v103_v49 }
  0x2e   :  { %v108_v52 = vmul.f32 %v104_v50, %v96_v46 }
  0x2f   :  { %v109_v53 = vmul.f32 %v105_v51, %v97_v48 }
  0x30   :  { %v110_v54 = vmul.f32 %v108_v52, %v104_v50 }
  0x31   :  { %v111_v55 = vmul.f32 %v109_v53, %v105_v51 }
  0x33   :  { %v121_v56 = vadd.f32 %v111_v55, %v110_v54 }
  0x35   :  { %122 = vadd.xlane.f32.xlu0 %v121_v56 }
  0xa8   :  { %v123_v57 = vpop.xlane.xlu0 %122 }
  0xa9   :  { %v124_v58 = vrot.slane %v123_v57, 4 }
  0xab   :  { %v125_v59 = vadd.f32 %v124_v58, %v123_v57 }
  0xad   :  { %v126_v60 = vrot.slane %v125_v59, 2 }
  0xaf   :  { %v127_v61 = vadd.f32 %v126_v60, %v125_v59 }
  0xb1   :  { %v128_v62 = vrot.slane %v127_v61, 1 }
  0xb3   :  { %v129_v63 = vadd.f32 %v128_v62, %v127_v61 }
  0xb5   :  { %150 = vpush %v129_v63 }
  0xe6   :  { %s151_s22 = spop %150 }
  0xe7   :  { %132 = sst [smem:[#allocation8]] %s151_s22 }
  0xe8   :  { %141 = dma.smem_to_hbm %s239_s23, 16, %s139_s21, [#allocation5]  }
  0xe9   :  { %233 = dma.done.wait [#allocation5], 16  }
  0xea   :  { %234 = vsyncadd [#allocation5], 4294967280 }
  0xeb   :  { %146 = sfence }
  0xec   :  { %147 = vsyncpa [#allocation4], 1 }
  0xed   :  { %148 = vsyncpa [#allocation7], 1 }
  0xee   :  { %149 = vsyncpa [#allocation5], 1 }

</bundles_post_ra>
